<compile_context>
chip_gen: v5e
topology: v5e:2x2
jax: 0.10.0
libtpu: 0.0.40
codegen_flags: <defaults>
</compile_context>

<pallas_src>
import jax
import jax.numpy as jnp
from jax.experimental import pallas as pl
from jax.experimental.pallas import tpu as pltpu


def _pos_enc_kernel(mu_ref, var_ref, pos_mu_ref, pos_logvar_ref,
                    mu_out_ref, var_out_ref):
    # mu/var/outs blocks: (TB, TD); pos_* blocks: (1, TD) (sublane broadcast).
    pos_mu = pos_mu_ref[...].astype(jnp.float32)
    pos_var = jnp.exp(pos_logvar_ref[...].astype(jnp.float32))  # EUP, f32 precision
    mu_out_ref[...] = (mu_ref[...].astype(jnp.float32) + pos_mu).astype(mu_out_ref.dtype)
    var_out_ref[...] = (var_ref[...].astype(jnp.float32) + pos_var).astype(var_out_ref.dtype)


def _vmem_budget():
    """Return (per-streamed-array block bytes, vmem_limit_bytes), generation-aware."""
    per_block, limit = 2 * 1024 * 1024, 32 * 1024 * 1024  # conservative fallback
    try:
        info = pltpu.get_tpu_info()
        vmem = getattr(info, "vmem_capacity_bytes", None)
        if vmem is not None:
            if vmem >= 96 * 1024 * 1024:
                # v5e / v6e: 128 MiB physical VMEM -> big blocks, 64 MiB scoped limit.
                per_block, limit = 4 * 1024 * 1024, 64 * 1024 * 1024
            else:
                # v7x: 64 MiB per TensorCore -> cap blocks / limit.
                per_block, limit = (5 * 1024 * 1024) // 2, 48 * 1024 * 1024
    except Exception:
        pass  # interpret mode / unknown chip: keep the safe defaults
    return per_block, limit


def _choose_tiles(B, LD, itemsize, per_block_bytes):
    """Fixed, aligned tile sizes; a pl.cdiv grid masks any ragged edge."""
    target_elems = max(128, per_block_bytes // itemsize)

    # Lane (last) dim: as wide as possible, multiple of 128 unless full extent.
    if LD <= target_elems:
        TD = LD                                    # full extent (always legal)
    else:
        TD = max(128, (target_elems // 128) * 128)

    # Sublane (row) dim: multiple of 8 unless full extent.
    rows_target = max(1, target_elems // TD)
    if B <= rows_target or B < 8:
        TB = B                                     # full extent (always legal)
    else:
        TB = max(8, (rows_target // 8) * 8)

    # v7x has 2 TensorCores: guarantee >= 2 grid steps along a parallel axis
    # for non-trivial problems so the second core isn't idle.
    total_bytes = B * LD * itemsize
    if total_bytes > (4 << 20) and pl.cdiv(B, TB) * pl.cdiv(LD, TD) < 2:
        if LD >= 256:
            TD = max(128, ((TD // 2) // 128) * 128)
        elif B >= 16:
            TB = max(8, ((TB // 2) // 8) * 8)
    return TB, TD


def positional_distribution_encoding(mu, var, pos_mu, pos_logvar,
                                     donate_inputs=False):
    """Apply positional encoding to a Gaussian distribution (mu, var).

    mu, var:             (B, L, D)
    pos_mu, pos_logvar:  (max_len, D); only the first L rows are used.
    Returns (mu_out, var_out), each (B, L, D).
    """
    B, L, D = mu.shape
    LD = L * D
    itemsize = jnp.dtype(mu.dtype).itemsize

    # Lane-dense 2D views: pos broadcasts only over B, so flattening (L, D) is exact.
    mu2 = mu.reshape(B, LD)
    var2 = var.reshape(B, LD)
    pos_mu2 = pos_mu[:L].reshape(1, LD)
    pos_logvar2 = pos_logvar[:L].reshape(1, LD)

    per_block_bytes, vmem_limit = _vmem_budget()
    TB, TD = _choose_tiles(B, LD, itemsize, per_block_bytes)

    nj = pl.cdiv(LD, TD)   # column tiles (outer -> pos blocks stay resident)
    ni = pl.cdiv(B, TB)    # batch tiles  (inner)
    grid = (nj, ni)

    extra_kwargs = {}
    if donate_inputs:
        # Only safe when the caller does not reuse mu/var afterwards.
        extra_kwargs["input_output_aliases"] = {0: 0, 1: 1}

    mu_out, var_out = pl.pallas_call(
        _pos_enc_kernel,
        out_shape=(
            jax.ShapeDtypeStruct((B, LD), mu.dtype),
            jax.ShapeDtypeStruct((B, LD), var.dtype),
        ),
        grid=grid,
        in_specs=[
            pl.BlockSpec((TB, TD), lambda j, i: (i, j)),   # mu
            pl.BlockSpec((TB, TD), lambda j, i: (i, j)),   # var
            pl.BlockSpec((1, TD), lambda j, i: (0, j)),    # pos_mu     (resident across i)
            pl.BlockSpec((1, TD), lambda j, i: (0, j)),    # pos_logvar (resident across i)
        ],
        out_specs=(
            pl.BlockSpec((TB, TD), lambda j, i: (i, j)),
            pl.BlockSpec((TB, TD), lambda j, i: (i, j)),
        ),
        compiler_params=pltpu.CompilerParams(
            dimension_semantics=("parallel", "parallel"),
            vmem_limit_bytes=vmem_limit,
        ),
        **extra_kwargs,
    )(mu2, var2, pos_mu2, pos_logvar2)

    return mu_out.reshape(B, L, D), var_out.reshape(B, L, D)


if __name__ == "__main__":
    # Small deterministic setup consistent with the module:
    #   max_len=16, d_model=32, batch B=2, sequence L=8
    key = jax.random.PRNGKey(0)
    k_mu, k_var, k_pmu, k_plv = jax.random.split(key, 4)

    B, L, D = 2, 8, 32
    max_len = 16

    mu = jax.random.normal(k_mu, (B, L, D), dtype=jnp.float32)
    # var must be positive (Gaussian variance)
    var = jax.nn.softplus(jax.random.normal(k_var, (B, L, D), dtype=jnp.float32)) + 1e-3

    # The PyTorch module inits the params to zeros; use small deterministic
    # random values so the kernel computation is non-trivial.
    pos_mu = 0.1 * jax.random.normal(k_pmu, (max_len, D), dtype=jnp.float32)
    pos_logvar = 0.1 * jax.random.normal(k_plv, (max_len, D), dtype=jnp.float32)

    mu_out, var_out = positional_distribution_encoding(mu, var, pos_mu, pos_logvar)
    jax.block_until_ready((mu_out, var_out))

    # Pure-JAX reference check
    mu_ref = mu + pos_mu[:L][None]
    var_ref = var + jnp.exp(pos_logvar[:L])[None]
    assert jnp.allclose(mu_out, mu_ref, atol=1e-6, rtol=1e-6)
    assert jnp.allclose(var_out, var_ref, atol=1e-6, rtol=1e-6)

    print("KERNEL_OK")
</pallas_src>

<mosaic_0001>
module attributes {stable_mosaic.version = 11 : i64} {
  func.func @_pos_enc_kernel(%arg0: i32, %arg1: i32, %arg2: memref<2x256xf32, #tpu.memory_space<vmem>>, %arg3: memref<2x256xf32, #tpu.memory_space<vmem>>, %arg4: memref<1x256xf32, #tpu.memory_space<vmem>>, %arg5: memref<1x256xf32, #tpu.memory_space<vmem>>, %arg6: memref<2x256xf32, #tpu.memory_space<vmem>>, %arg7: memref<2x256xf32, #tpu.memory_space<vmem>>) attributes {dimension_semantics = [#tpu.dimension_semantics<parallel>, #tpu.dimension_semantics<parallel>], iteration_bounds = array<i64: 1, 1>, scalar_prefetch = 0 : i64, scratch_operands = 0 : i64, tpu.core_type = #tpu.core_type<tc>, window_params = [{transform_indices = @transform_0, window_bounds = array<i64: 2, 256>}, {transform_indices = @transform_1, window_bounds = array<i64: 2, 256>}, {transform_indices = @transform_2, window_bounds = array<i64: 1, 256>}, {transform_indices = @transform_3, window_bounds = array<i64: 1, 256>}, {transform_indices = @transform_4, window_bounds = array<i64: 2, 256>}, {transform_indices = @transform_5, window_bounds = array<i64: 2, 256>}]} {
    %c0 = arith.constant 0 : index
    %c0_0 = arith.constant 0 : index
    %0 = vector.load %arg4[%c0, %c0_0] : memref<1x256xf32, #tpu.memory_space<vmem>>, vector<1x256xf32>
    %c0_1 = arith.constant 0 : index
    %c0_2 = arith.constant 0 : index
    %1 = vector.load %arg5[%c0_1, %c0_2] : memref<1x256xf32, #tpu.memory_space<vmem>>, vector<1x256xf32>
    %2 = math.exp %1 : vector<1x256xf32>
    %c0_3 = arith.constant 0 : index
    %c0_4 = arith.constant 0 : index
    %3 = vector.load %arg2[%c0_3, %c0_4] : memref<2x256xf32, #tpu.memory_space<vmem>>, vector<2x256xf32>
    %4 = vector.broadcast %0 : vector<1x256xf32> to vector<2x256xf32>
    %5 = arith.addf %3, %4 : vector<2x256xf32>
    %c0_5 = arith.constant 0 : index
    %c0_6 = arith.constant 0 : index
    %6 = vector.load %arg6[%c0_5, %c0_6] : memref<2x256xf32, #tpu.memory_space<vmem>>, vector<2x256xf32>
    tpu.vector_store %arg6[%c0_5, %c0_6], %5 {strides = array<i32>} : memref<2x256xf32, #tpu.memory_space<vmem>>, vector<2x256xf32>,
    %c0_7 = arith.constant 0 : index
    %c0_8 = arith.constant 0 : index
    %7 = vector.load %arg3[%c0_7, %c0_8] : memref<2x256xf32, #tpu.memory_space<vmem>>, vector<2x256xf32>
    %8 = vector.broadcast %2 : vector<1x256xf32> to vector<2x256xf32>
    %9 = arith.addf %7, %8 : vector<2x256xf32>
    %c0_9 = arith.constant 0 : index
    %c0_10 = arith.constant 0 : index
    %10 = vector.load %arg7[%c0_9, %c0_10] : memref<2x256xf32, #tpu.memory_space<vmem>>, vector<2x256xf32>
    tpu.vector_store %arg7[%c0_9, %c0_10], %9 {strides = array<i32>} : memref<2x256xf32, #tpu.memory_space<vmem>>, vector<2x256xf32>,
    return
  }
  func.func @transform_0(%arg0: i32, %arg1: i32) -> (i32, i32) {
    %c0_i32 = arith.constant 0 : i32
    return %arg1, %arg0 : i32, i32
  }
  func.func @transform_1(%arg0: i32, %arg1: i32) -> (i32, i32) {
    %c0_i32 = arith.constant 0 : i32
    return %arg1, %arg0 : i32, i32
  }
  func.func @transform_2(%arg0: i32, %arg1: i32) -> (i32, i32) {
    %c0_i32 = arith.constant 0 : i32
    %c0_i32_0 = arith.constant 0 : i32
    return %c0_i32, %arg0 : i32, i32
  }
  func.func @transform_3(%arg0: i32, %arg1: i32) -> (i32, i32) {
    %c0_i32 = arith.constant 0 : i32
    %c0_i32_0 = arith.constant 0 : i32
    return %c0_i32, %arg0 : i32, i32
  }
  func.func @transform_4(%arg0: i32, %arg1: i32) -> (i32, i32) {
    %c0_i32 = arith.constant 0 : i32
    return %arg1, %arg0 : i32, i32
  }
  func.func @transform_5(%arg0: i32, %arg1: i32) -> (i32, i32) {
    %c0_i32 = arith.constant 0 : i32
    return %arg1, %arg0 : i32, i32
  }
}

</mosaic_0001>

<bundles_post_ra>
// kernel: tpu_custom_call.1
= control target key start
LH: loop header
LB: loop body
LE: loop exit
PB: predicated region body
PF: predicated region fallthrough
CT: control target
= control target key end

     0   :  { %11 = vsyncpa [#allocation3], 0  ;;  %s309_s0 = inlined_call_operand.hbm [shape: f32[2,256], index: 0, kind: input, shape index: {}]   ;;  %s310_s1 = inlined_call_operand.hbm [shape: f32[2,256], index: 1, kind: input, shape index: {}]   ;;  %s311_s2 = inlined_call_operand.hbm [shape: f32[1,256], index: 2, kind: input, shape index: {}]   ;;  %s312_s3 = inlined_call_operand.vmem [shape: f32[1,256], index: 3, kind: input, shape index: {}]   ;;  %s313_s4 = inlined_call_operand.hbm [shape: f32[2,256], index: 4, kind: output, shape index: {0}]   ;;  %s314_s5 = inlined_call_operand.hbm [shape: f32[2,256], index: 5, kind: output, shape index: {1}]  }
   0x1   :  { %12 = vsyncpa [#allocation6], 0 }
   0x2   :  { %13 = vsyncpa [#allocation4], 0  ;;  %s31_s20 = sshll.u32 %s310_s1, 4  ;;  %s32_s20 = int_to_ptr.hbm [resolvable:$true] %s31_s20 }
   0x3   :  { %14 = vsyncpa [#allocation10], 0  ;;  %s254_s21 = smov [#allocation5]   ;;  %s20_s25 = sshll.u32 %s309_s0, 4  ;;  %s21_s25 = int_to_ptr.hbm [resolvable:$true] %s20_s25 }
   0x4   :  { %s33_s22 = sshll.u32 %s254_s21, 4  ;;  %s255_s26 = smov [#allocation2]   ;;  %s34_s22 = int_to_ptr.vmem [resolvable:$true] %s33_s22 }
   0x5   :  { %36 = dma.hbm_to_vmem [thread:$0]  %s32_s20, 64, %s34_s22, [#allocation6]  }
   0x6   :  { %s22_s27 = sshll.u32 %s255_s26, 4  ;;  %s42_s30 = sshll.u32 %s311_s2, 4  ;;  %s23_s27 = int_to_ptr.vmem [resolvable:$true] %s22_s27  ;;  %s43_s30 = int_to_ptr.hbm [resolvable:$true] %s42_s30 }
   0x7   :  { %25 = dma.hbm_to_vmem [thread:$0]  %s21_s25, 64, %s23_s27, [#allocation3]  }
   0x8   :  { %s256_s1 = smov [#allocation7]  }
   0x9   :  { %s44_s6 = sshll.u32 %s256_s1, 4  ;;  %s45_s6 = int_to_ptr.vmem [resolvable:$true] %s44_s6 }
   0xa   :  { %47 = dma.hbm_to_vmem [thread:$0]  %s43_s30, 32, %s45_s6, [#allocation6]  }
   0xb   :  { %246 = dma.done.wait [#allocation3], 64  }
   0xc   :  { %247 = vsyncadd [#allocation3], 4294967232 }
   0xd   :  { %248 = dma.done.wait [#allocation6], 96  }
   0xe   :  { %249 = vsyncadd [#allocation6], 4294967200  ;;  %v62_v0 = vld [vmem:[#allocation7] sm:$0x3]  ;;  %v63_v1 = vld [vmem:[%s312_s3] sm:$0x3] }
   0xf   :  { %v68_v2 = vperm.slane %v62_v0, 0  ;;  %v69_v3 = vperm.slane %v62_v0, 1  ;;  %v64_v4 = vmul.f32 1.442695, %v63_v1  ;;  %vm71_vm0 = vcmask 1041408   ;;  %s257_s2 = smov [#allocation8]  }
  0x10   :  { %v66_v5 = vld [vmem:[#allocation2] sm:$0xf]  ;;  %s90_s8 = sshll.u32 %s257_s2, 4  ;;  %s92_s11 = sshll.u32 %s313_s4, 4  ;;  %v76_v12 = vld [vmem:[#allocation5] sm:$0xf]  ;;  %s91_s8 = int_to_ptr.vmem [resolvable:$true] %s90_s8  ;;  %s93_s11 = int_to_ptr.hbm [resolvable:$true] %s92_s11 }
  0x11   :  { %v70_v6 = vrot.slane %v69_v3, 6  ;;  %124 = vpow2.f32 %v64_v4  ;;  %s258_s3 = smov [#allocation9]   ;;  %s103_s15 = sshll.u32 %s314_s5, 4  ;;  %s104_s15 = int_to_ptr.hbm [resolvable:$true] %s103_s15 }
  0x12   :  { %s101_s12 = sshll.u32 %s258_s3, 4  ;;  %s102_s12 = int_to_ptr.vmem [resolvable:$true] %s101_s12 }
  0x13   :  { %v72_v7 = vsel %vm71_vm0, %v68_v2, %v70_v6 }
  0x14   :  { %v74_v8 = vadd.f32 %v72_v7, %v66_v5 }
  0x16   :  { %75 = vst [vmem:[#allocation8] sm:$0xf] %v74_v8 }
  0x17   :  { %v125_v9 = vpop.eup %124  ;;  %95 = dma.vmem_to_hbm [thread:$0]  %s91_s8, 64, %s93_s11, [#allocation4]  }
  0x18   :  { %v78_v10 = vperm.slane %v125_v9, 0  ;;  %v79_v11 = vperm.slane %v125_v9, 1 }
  0x1a   :  { %v80_v13 = vrot.slane %v79_v11, 6 }
  0x1c   :  { %v81_v14 = vsel %vm71_vm0, %v78_v10, %v80_v13 }
  0x1d   :  { %v83_v15 = vadd.f32 %v81_v14, %v76_v12 }
  0x1f   :  { %84 = vst [vmem:[#allocation9] sm:$0xf] %v83_v15 }
  0x20   :  { %106 = dma.vmem_to_hbm [thread:$0]  %s102_s12, 64, %s104_s15, [#allocation10]  }
  0x21   :  { %250 = dma.done.wait [#allocation4], 64  }
  0x22   :  { %251 = vsyncadd [#allocation4], 4294967232 }
  0x23   :  { %252 = dma.done.wait [#allocation10], 64  }
  0x24   :  { %253 = vsyncadd [#allocation10], 4294967232 }
  0x25   :  { %115 = vsyncpa [#allocation3], 1 }
  0x26   :  { %116 = vsyncpa [#allocation6], 1 }
  0x27   :  { %117 = vsyncpa [#allocation4], 1 }
  0x28   :  { %118 = vsyncpa [#allocation10], 1 }

</bundles_post_ra>
